<compile_context>
chip_gen: v7x
topology: tpu7x:2x2x1
jax: 0.10.0
libtpu: 0.0.40
codegen_flags: <defaults>
</compile_context>

<pallas_src>
import functools

import jax
import jax.numpy as jnp
from jax import lax
from jax.experimental import pallas as pl
from jax.experimental.pallas import tpu as pltpu


def _gated_conv_kernel(w_ref, p_ref, o_ref, *, c_out, elu_alpha):
    """Fused GatedConv2d tile: one MXU matmul + ELU/sigmoid gating epilogue.

    w_ref : (2*Cout, KKC)  bf16 combined [conv ; composed-mask] weights
                           (biases folded into the tap-(0,0) ones-channel row).
    p_ref : (KKC, TM)      bf16 pre-transposed im2col tile (canonical MXU layout).
    o_ref : (Cout, TM)     f32 lane-dense output tile (channel-major).
    """
    # Single MXU matmul, f32 accumulate; result is already lane-dense.
    acc = jnp.dot(w_ref[...], p_ref[...],
                  preferred_element_type=jnp.float32)          # (2*Cout, TM) f32

    conv = acc[:c_out, :]                                      # (Cout, TM)
    mask = acc[c_out:, :]                                      # (Cout, TM)

    # ELU(conv) * sigmoid(mask), full lane width, f32 vector math.
    conv = jnp.where(conv > 0.0, conv,
                     elu_alpha * (jnp.exp(jnp.minimum(conv, 0.0)) - 1.0))
    gate = pl.reciprocal(1.0 + jnp.exp(-mask), approx=True)    # EUP, not VPU divide
    o_ref[...] = (conv * gate).astype(o_ref.dtype)             # unmasked vst


def gated_conv2d(x_nchw, conv_w, conv_b, dw_w, dw_b, pw_w, pw_b, *,
                 kernel_size=3, padding=1, elu_alpha=1.0):
    """GatedConv2d forward (defaults: replicate pad, ELU, no norm, sc=False).

    x_nchw : (N, Cin, H, W) float32
    conv_w : (Cout, Cin, K, K), conv_b: (Cout,)        main conv
    dw_w   : (Cin, 1, K, K),    dw_b:  (Cin,)          depthwise mask conv
    pw_w   : (Cout, Cin, 1, 1), pw_b:  (Cout,)         pointwise mask conv
    returns: (N, Cout, Hout, Wout)  NCHW (same as PyTorch)
    """
    n, c_in, h, w = x_nchw.shape
    c_out = conv_w.shape[0]
    k = kernel_size
    h_out = h + 2 * padding - k + 1          # stride=1, dilation=1
    w_out = w + 2 * padding - k + 1
    m = n * h_out * w_out

    # Channels padded to a multiple of 8; channel c_in is a constant-1 bias
    # carrier (replicate padding keeps it at 1, zero-pad channels at 0).
    c_aug = ((c_in + 1 + 7) // 8) * 8
    kkc = k * k * c_aug

    # ---- glue: channel-major layout + bias carrier + replicate pad ----------
    x_c = jnp.transpose(x_nchw, (1, 0, 2, 3))                       # (Cin, N, H, W)
    carrier = jnp.ones((1, n, h, w), x_nchw.dtype)
    pad_ch = jnp.zeros((c_aug - c_in - 1, n, h, w), x_nchw.dtype)
    x_aug = jnp.concatenate([x_c, carrier, pad_ch], axis=0)          # (Caug, N, H, W)
    x_pad = jnp.pad(x_aug,
                    ((0, 0), (0, 0), (padding, padding), (padding, padding)),
                    mode='edge')                                     # (Caug, N, Hp, Wp)

    # ---- glue: pre-transposed im2col P^T (KKC, M); sublane-aligned concat ----
    rows = []
    for kh in range(k):
        for kw in range(k):
            rows.append(
                x_pad[:, :, kh:kh + h_out, kw:kw + w_out].reshape(c_aug, m))
    p_t = jnp.concatenate(rows, axis=0)                              # (KKC, M)

    # ---- fold conv + (depthwise∘pointwise) mask conv + biases into one W ----
    w_full = jnp.zeros((k, k, c_aug, 2 * c_out), jnp.float32)
    # main conv:  W[kh,kw,ci,co] = conv_w[co,ci,kh,kw]
    w_full = w_full.at[:, :, :c_in, :c_out].set(jnp.transpose(conv_w, (2, 3, 1, 0)))
    # mask path: depthwise then 1x1 == full conv with
    #   Wm[kh,kw,ci,co] = dw_w[ci,0,kh,kw] * pw_w[co,ci]
    pw_mat = pw_w.reshape(c_out, c_in)                               # (Cout, Cin)
    dw_t = jnp.transpose(dw_w[:, 0], (1, 2, 0))                      # (K, K, Cin)
    mask_w = dw_t[..., None] * pw_mat.T[None, None, :, :]            # (K, K, Cin, Cout)
    w_full = w_full.at[:, :, :c_in, c_out:].set(mask_w)
    # biases carried by the ones channel at tap (0,0)
    mask_b = pw_mat @ dw_b + pw_b                                    # (Cout,)
    w_full = w_full.at[0, 0, c_in, :c_out].set(conv_b)
    w_full = w_full.at[0, 0, c_in, c_out:].set(mask_b)
    w_t = w_full.reshape(kkc, 2 * c_out).T                           # (2*Cout, KKC)

    # bf16 MXU operands; accumulation/epilogue stay f32 inside the kernel.
    p_mxu = p_t.astype(jnp.bfloat16)
    w_mxu = w_t.astype(jnp.bfloat16)

    # ---- lane tile over output pixels (multiple of 128) ---------------------
    if m >= 8 * 2048:
        tile_m = 2048
    elif m >= 1024:
        tile_m = 512
    else:
        tile_m = 256
    m_pad = pl.cdiv(m, tile_m) * tile_m
    if m_pad != m:
        p_mxu = jnp.pad(p_mxu, ((0, 0), (0, m_pad - m)))

    kernel = functools.partial(_gated_conv_kernel, c_out=c_out, elu_alpha=elu_alpha)

    out_t = pl.pallas_call(
        kernel,
        out_shape=jax.ShapeDtypeStruct((c_out, m_pad), jnp.float32),
        grid=(m_pad // tile_m,),
        in_specs=[pl.BlockSpec((2 * c_out, kkc), lambda i: (0, 0)),   # tiny W, resident
                  pl.BlockSpec((kkc, tile_m), lambda i: (0, i))],     # P^T lane tile
        out_specs=pl.BlockSpec((c_out, tile_m), lambda i: (0, i)),    # lane-dense store
        compiler_params=pltpu.CompilerParams(
            dimension_semantics=("parallel",)),                       # 2 TCs on v7x
    )(w_mxu, p_mxu)

    out_t = out_t[:, :m]
    # (Cout, N*Hout*Wout) -> NCHW (PyTorch-compatible return layout)
    return jnp.transpose(out_t.reshape(c_out, n, h_out, w_out), (1, 0, 2, 3))


def _reference(x_nchw, conv_w, conv_b, dw_w, dw_b, pw_w, pw_b, *,
               kernel_size=3, padding=1, elu_alpha=1.0):
    """Pure-JAX f32 reference (lax convs) matching the PyTorch module defaults."""
    c_in = x_nchw.shape[1]
    x_nhwc = jnp.transpose(x_nchw, (0, 2, 3, 1))
    x_pad = jnp.pad(x_nhwc, ((0, 0), (padding, padding), (padding, padding), (0, 0)),
                    mode='edge')
    dn = ("NHWC", "HWIO", "NHWC")
    conv = lax.conv_general_dilated(
        x_pad, jnp.transpose(conv_w, (2, 3, 1, 0)), (1, 1), "VALID",
        dimension_numbers=dn) + conv_b[None, None, None, :]
    dw = lax.conv_general_dilated(
        x_pad, jnp.transpose(dw_w, (2, 3, 1, 0)), (1, 1), "VALID",
        dimension_numbers=dn, feature_group_count=c_in) + dw_b[None, None, None, :]
    mask = lax.conv_general_dilated(
        dw, jnp.transpose(pw_w, (2, 3, 1, 0)), (1, 1), "VALID",
        dimension_numbers=dn) + pw_b[None, None, None, :]
    conv = jnp.where(conv > 0, conv,
                     elu_alpha * (jnp.exp(jnp.minimum(conv, 0.0)) - 1.0))
    gate = 1.0 / (1.0 + jnp.exp(-mask))
    return jnp.transpose(conv * gate, (0, 3, 1, 2))   # NCHW


if __name__ == "__main__":
    # GatedConv2d(in=4, out=8, kernel=3, padding=1) with module defaults:
    # stride=1, dilation=1, pad_type='replicate', activation='elu', norm='none',
    # sc=False (depth-separable mask conv), sn=False.
    # TODO(synk): other config branches (reflect/zero/spherical pad, bn/in norm,
    #             other activations, sc=True, spectral norm) are not exercised.
    N, C_IN, H, W = 2, 4, 16, 16
    C_OUT, K, PAD = 8, 3, 1

    key = jax.random.PRNGKey(0)
    keys = jax.random.split(key, 7)
    x = jax.random.normal(keys[0], (N, C_IN, H, W), dtype=jnp.float32)
    conv_w = 0.1 * jax.random.normal(keys[1], (C_OUT, C_IN, K, K), dtype=jnp.float32)
    conv_b = 0.1 * jax.random.normal(keys[2], (C_OUT,), dtype=jnp.float32)
    dw_w = 0.1 * jax.random.normal(keys[3], (C_IN, 1, K, K), dtype=jnp.float32)
    dw_b = 0.1 * jax.random.normal(keys[4], (C_IN,), dtype=jnp.float32)
    pw_w = 0.1 * jax.random.normal(keys[5], (C_OUT, C_IN, 1, 1), dtype=jnp.float32)
    pw_b = 0.1 * jax.random.normal(keys[6], (C_OUT,), dtype=jnp.float32)

    out = gated_conv2d(x, conv_w, conv_b, dw_w, dw_b, pw_w, pw_b,
                       kernel_size=K, padding=PAD)
    out = jax.block_until_ready(out)

    ref = _reference(x, conv_w, conv_b, dw_w, dw_b, pw_w, pw_b,
                     kernel_size=K, padding=PAD)
    assert out.shape == (N, C_OUT, H, W), out.shape
    # bf16 MXU operands -> loosened tolerance vs the f32 reference.
    assert jnp.allclose(out, ref, atol=3e-2, rtol=3e-2), "mismatch vs reference"

    print("KERNEL_OK")
</pallas_src>

<mosaic_0001>
module attributes {stable_mosaic.version = 11 : i64} {
  func.func @_gated_conv_kernel(%arg0: i32, %arg1: memref<16x72xbf16, #tpu.memory_space<vmem>>, %arg2: memref<72x256xbf16, #tpu.memory_space<vmem>>, %arg3: memref<8x256xf32, #tpu.memory_space<vmem>>) attributes {dimension_semantics = [#tpu.dimension_semantics<parallel>], iteration_bounds = array<i64: 2>, scalar_prefetch = 0 : i64, scratch_operands = 0 : i64, tpu.core_type = #tpu.core_type<tc>, window_params = [{pipeline_mode = #tpu.pipeline_mode<synchronous>, transform_indices = @transform_0, window_bounds = array<i64: 16, 72>}, {transform_indices = @transform_1, window_bounds = array<i64: 72, 256>}, {transform_indices = @transform_2, window_bounds = array<i64: 8, 256>}]} {
    %c0 = arith.constant 0 : index
    %c0_0 = arith.constant 0 : index
    %0 = vector.load %arg1[%c0, %c0_0] : memref<16x72xbf16, #tpu.memory_space<vmem>>, vector<16x72xbf16>
    %c0_1 = arith.constant 0 : index
    %c0_2 = arith.constant 0 : index
    %1 = vector.load %arg2[%c0_1, %c0_2] : memref<72x256xbf16, #tpu.memory_space<vmem>>, vector<72x256xbf16>
    %cst = arith.constant dense<0.000000e+00> : vector<16x256xf32>
    %2 = tpu.matmul %0, %1, %cst {dimension_numbers = #tpu.dot_dimension_numbers<[1], [0], [0], [1], [0, 0, 1, 1], [], []>} : vector<16x72xbf16>, vector<72x256xbf16>, vector<16x256xf32> -> vector<16x256xf32>
    %3 = vector.extract_strided_slice %2 {offsets = [0, 0], sizes = [8, 256], strides = [1, 1]} : vector<16x256xf32> to vector<8x256xf32>
    %4 = vector.extract_strided_slice %2 {offsets = [8, 0], sizes = [8, 256], strides = [1, 1]} : vector<16x256xf32> to vector<8x256xf32>
    %cst_3 = arith.constant 0.000000e+00 : f32
    %5 = vector.broadcast %cst_3 : f32 to vector<8x256xf32>
    %6 = arith.cmpf ogt, %3, %5 : vector<8x256xf32>
    %cst_4 = arith.constant 0.000000e+00 : f32
    %7 = vector.broadcast %cst_4 : f32 to vector<8x256xf32>
    %8 = arith.minimumf %3, %7 : vector<8x256xf32>
    %9 = math.exp %8 : vector<8x256xf32>
    %cst_5 = arith.constant 1.000000e+00 : f32
    %10 = vector.broadcast %cst_5 : f32 to vector<8x256xf32>
    %11 = arith.subf %9, %10 : vector<8x256xf32>
    %cst_6 = arith.constant 1.000000e+00 : f32
    %12 = vector.broadcast %cst_6 : f32 to vector<8x256xf32>
    %13 = arith.mulf %12, %11 : vector<8x256xf32>
    %14 = arith.select %6, %3, %13 : vector<8x256xi1>, vector<8x256xf32>
    %cst_7 = arith.constant 0.000000e+00 : f32
    %15 = vector.broadcast %cst_7 : f32 to vector<8x256xf32>
    %16 = arith.subf %15, %4 : vector<8x256xf32>
    %17 = math.exp %16 : vector<8x256xf32>
    %cst_8 = arith.constant 1.000000e+00 : f32
    %18 = vector.broadcast %cst_8 : f32 to vector<8x256xf32>
    %19 = arith.addf %18, %17 : vector<8x256xf32>
    %20 = tpu.reciprocal %19 {approx = true} : vector<8x256xf32> -> vector<8x256xf32>
    %21 = arith.mulf %14, %20 : vector<8x256xf32>
    %c0_9 = arith.constant 0 : index
    %c0_10 = arith.constant 0 : index
    %22 = vector.load %arg3[%c0_9, %c0_10] : memref<8x256xf32, #tpu.memory_space<vmem>>, vector<8x256xf32>
    tpu.vector_store %arg3[%c0_9, %c0_10], %21 {strides = array<i32>} : memref<8x256xf32, #tpu.memory_space<vmem>>, vector<8x256xf32>,
    return
  }
  func.func @transform_0(%arg0: i32) -> (i32, i32) {
    %c0_i32 = arith.constant 0 : i32
    %c0_i32_0 = arith.constant 0 : i32
    %c0_i32_1 = arith.constant 0 : i32
    return %c0_i32, %c0_i32_0 : i32, i32
  }
  func.func @transform_1(%arg0: i32) -> (i32, i32) {
    %c0_i32 = arith.constant 0 : i32
    %c0_i32_0 = arith.constant 0 : i32
    return %c0_i32, %arg0 : i32, i32
  }
  func.func @transform_2(%arg0: i32) -> (i32, i32) {
    %c0_i32 = arith.constant 0 : i32
    %c0_i32_0 = arith.constant 0 : i32
    return %c0_i32, %arg0 : i32, i32
  }
}

</mosaic_0001>

<bundles_post_ra>
// kernel: tpu_custom_call.1
= control target key start
LH: loop header
LB: loop body
LE: loop exit
PB: predicated region body
PF: predicated region fallthrough
CT: control target
= control target key end

     0   :  { %7 = vsyncpa [#allocation3], 0  ;;  %s894_s0 = inlined_call_operand.hbm [shape: bf16[16,72], index: 0, kind: input, shape index: {}]   ;;  %s895_s1 = inlined_call_operand.hbm [shape: bf16[72,512], index: 1, kind: input, shape index: {}]   ;;  %s896_s2 = inlined_call_operand.hbm [shape: f32[8,512], index: 2, kind: output, shape index: {}]  }
   0x1   :  { %8 = vsyncpa [#allocation6], 0 }
   0x2   :  { %10 = vsyncpa [#allocation6 + $0x1], 0 }
   0x3   :  { %11 = vsyncpa [#allocation4], 0 }
   0x4   :  { %13 = vsyncpa [#allocation4 + $0x1], 0  ;;  %s695_s9 = smov 0   ;;  %s697_s10 = smov 0  }
   0x5   :  { %s699_s11 = smov 0   ;;  %s701_s12 = smov 0  }
   0x6 LB: > { %s716_s13 = sadd.s32 4294967295, %s669_s12   ;;  %s418_s14 = sadd.s32 4294967294, %s669_s12   ;;  %s669_s12 = sphi %s701_s12, %s920_s12   ;;  %s665_s11 = sphi %s699_s11, %s919_s11   ;;  %s661_s10 = sphi %s697_s10, %s918_s10   ;;  %s657_s9 = sphi %s695_s9, %s917_s9  }
   0x7   : > { %s720_s15 = sadd.s32 1, %s669_s12   ;;  %s47_s16 = sadd.s32 1, %s665_s11 }
   0x8   : > { %s44_s17 = ssub.s32 %s669_s12, %s720_s15  ;;  %p54_p0 = scmp.ne.s32.totalorder %s665_s11, %s661_s10 }
   0x9   : > { %p45_p1 = scmp.eq.s32.totalorder %s44_s17, 0  ;;  %p55_p2 = scmp.eq.s32.totalorder %s669_s12, 0 }
   0xa   : > { %p60_p3 = scmp.ne.s32.totalorder %s661_s10, %s657_s9  ;;  %p897_p4 = scmp.eq.s32.totalorder %s716_s13, 0 }
   0xb   : > { %s732_s18 = scalar_select %p45_p1, %s665_s11, %s47_s16  }
   0xc   : > { %p734_p5 = por %p55_p2, %p54_p0  ;;  %p740_p6 = por %p897_p4, %p60_p3 }
   0xd   : > { %p84_p7 = scmp.eq.s32.totalorder %s716_s13, 1  ;;  %p90_p8 = scmp.eq.s32.totalorder %s418_s14, 1 }
   0xe   : > { %s901_s19 = scalar_select %p734_p5, 1, 0 }
   0xf   : > { %s902_s20 = scalar_select %p740_p6, 1, 0 }
  0x10   : > { %p419_p9 = scmp.ge.s32.totalorder %s669_s12, 1  ;;  %p97_p10 = scmp.lt.s32.totalorder %s669_s12, 3 }
  0x11   : > { %p747_p11 = por %p84_p7, %p54_p0  ;;  %p751_p12 = por %p90_p8, %p60_p3 }
  0x12   : > { %p755_p13 = pnand %p419_p9, %p97_p10  ;;  %s671_s24 = smov [#allocation2]  }
  0x13   : > { %s903_s21 = scalar_select %p747_p11, 1, 0 }
  0x14   : > { %s904_s22 = scalar_select %p751_p12, 1, 0 }
  0x15   : > { %s905_s23 = scalar_select %p755_p13, 1, 0 }
  0x16   : > { %p459_p1 = pneg %p755_p13  ;;  %s109_s25 = sshll.u32 %s671_s24, 4  ;;  %s110_s25 = int_to_ptr.vmem [resolvable:$true] %s109_s25 }
  0x17   : > { %s123_s27 = sand.u32 1, %s665_s11   ;;  %s541_s30 = scalar_lea.hbm %s894_s0, 128 }
  0x18   : > { %p763_p2 = pnand %p459_p1, %p897_p4  ;;  %p542_p7 = scmp.ne.s32.totalorder %s894_s0, %s541_s30 }
  0x19   : > { %p548_p1 = scmp.lt.u32.totalorder %s541_s30, %s894_s0 }
  0x1a   : > { %p543_p8 = pneg %p763_p2 }
  0x1c   : > { %p544_p9 = pnand %p543_p8, %p542_p7 }
  0x1e   : > { %p545_p10 = pneg %p544_p9 }
  0x20   : > { %p550_p4 = pnand %p548_p1, %p545_p10 }
  0x22   : > { %553 = shalt.err (!%p550_p4)
}
  0x23   : > { %s554_s7 = scalar_lea.vmem %s110_s25, 128  ;;  %p562_p11 = scmp.lt.s32.totalorder %s110_s25, %s110_s25 }
  0x24   : > { %p555_p0 = scmp.ne.s32.totalorder %s110_s25, %s554_s7  ;;  %p563_p6 = scmp.lt.s32.totalorder %s554_s7, %s554_s7 }
  0x26   : > { %p557_p3 = pnand %p555_p0, %p543_p8  ;;  %p564_p13 = por %p563_p6, %p562_p11 }
  0x28   : > { %p558_p12 = pneg %p557_p3 }
  0x2a   : > { %p565_p5 = pnand %p564_p13, %p558_p12 }
  0x2c   : > { %568 = shalt.err (!%p565_p5)
}
  0x2d   : > { %s672_s8 = smov 64   ;;  %s673_s14 = smov 4  }
  0x2e   : > { %462 = dma.hbm_to_vmem [thread:$0]  (!%p763_p2), %s894_s0, 128, %s110_s25, [#allocation3], %s672_s8, %s672_s8, %s673_s14  }
  0x2f   : > { %p907_p4 = scmp.ne.s32.totalorder %s901_s19, 0  ;;  %p908_p7 = scmp.lt.s32.totalorder %s669_s12, 2 }
  0x30   : > { %s449_s28 = smul.u32 72, %s123_s27  ;;  %s447_s29 = sshll.u32 %s669_s12, 7 }
  0x31   : > { %p790_p0 = pnand %p908_p7, %p907_p4  ;;  %s798_s4 = scalar_lea.hbm %s895_s1, %s447_s29 }
  0x32   : > { %s127_s25 = scalar_lea.vmem [#allocation5], %s449_s28  ;;  %s802_s26 = scalar_lea.sflag [#allocation6], %s123_s27 }
  0x33   : > { %s134_s19 = sshll.u32 %s127_s25, 4  ;;  %s569_s5 = scalar_lea.hbm %s798_s4, 1152  ;;  %s800_s19 = int_to_ptr.vmem [resolvable:$true] %s134_s19 }
  0x34   : > { %p570_p5 = scmp.ne.s32.totalorder %s798_s4, %s569_s5  ;;  %p571_p6 = pneg %p790_p0 }
  0x35   : > { %s574_s8 = scalar_lea.hbm %s895_s1, 2304  ;;  %p575_p13 = scmp.lt.u32.totalorder %s798_s4, %s895_s1 }
  0x36   : > { %p572_p11 = pnand %p571_p6, %p570_p5  ;;  %p576_p2 = scmp.lt.u32.totalorder %s574_s8, %s569_s5 }
  0x37   : > { %p578_p8 = scmp.lt.u32.totalorder %s569_s5, %s798_s4 }
  0x38   : > { %p573_p12 = pneg %p572_p11  ;;  %p577_p3 = por %p576_p2, %p575_p13 }
  0x3a   : > { %p579_p9 = por %p578_p8, %p577_p3 }
  0x3c   : > { %p580_p10 = pnand %p579_p9, %p573_p12 }
  0x3e   : > { %583 = shalt.err (!%p580_p10)
}
  0x3f   : > { %s584_s27 = scalar_lea.vmem %s800_s19, 1152  ;;  %s674_s17 = smov [#allocation5]  }
  0x40   : > { %p585_p1 = scmp.ne.s32.totalorder %s800_s19, %s584_s27  ;;  %s589_s28 = sshll.u32 %s674_s17, 4  ;;  %s590_s28 = int_to_ptr.vmem [resolvable:$false] %s589_s28 }
  0x41   : > { %s591_s29 = scalar_lea.vmem %s590_s28, 2304  ;;  %p592_p5 = scmp.lt.s32.totalorder %s800_s19, %s590_s28 }
  0x42   : > { %p587_p4 = pnand %p585_p1, %p571_p6  ;;  %p593_p11 = scmp.lt.s32.totalorder %s591_s29, %s584_s27 }
  0x44   : > { %p588_p7 = pneg %p587_p4  ;;  %p594_p13 = por %p593_p11, %p592_p5 }
  0x46   : > { %p595_p2 = pnand %p594_p13, %p588_p7 }
  0x48   : > { %598 = shalt.err (!%p595_p2)
}
  0x49   : > { %s675_s30 = smov 256   ;;  %s676_s3 = smov 128  }
  0x4a   : > { %s677_s25 = smov 8   ;;  %p910_p6 = scmp.ne.s32.totalorder %s905_s23, 0 }
  0x4b   : > { %466 = dma.hbm_to_vmem [thread:$0]  (!%p790_p0), %s798_s4, 1152, %s800_s19, %s802_s26, %s675_s30, %s676_s3, %s677_s25  }
  0x4c   : > { %146 = sbr.rel (%p910_p6) target bundleno = 369 (0x171), region = 28  ;;  %p911_p12 = scmp.eq.s32.totalorder (!%p910_p6), %s716_s13, 0 }
  0x53   : > { %644 = dma.done.wait (%p911_p12), [#allocation3], 128   ;;  %p912_p3 = pmov %p911_p12 }
  0x54   : > { %s837_s5 = sand.u32 1, %s661_s10   ;;  %p913_p8 = scmp.ne.s32.totalorder %s902_s20, 0 }
  0x55   : > { %646 = vsyncadd (%p912_p3), [#allocation3], 4294967168  ;;  %s450_s6 = smul.u32 72, %s837_s5  ;;  %s153_s7 = scalar_lea.sflag [#allocation6], %s837_s5 }
  0x57   : > { %s156_s8 = scalar_lea.vmem [#allocation5], %s450_s6 }
  0x58   : > { %648 = dma.done.wait (%p913_p8), %s153_s7, 1152  }
  0x59   : > { %650 = vsyncadd (%p913_p8), %s153_s7, 4294966144  ;;  %v678_v0 = vmov 0   ;;  %v514_v1 = vld [vmem:[%s156_s8 + $0x4] ss:$8 sps:$4 sm:$0xff]   ;;  %v516_v2 = vld [vmem:[%s156_s8] ss:$8 sps:$4 sm:$0xff]  }
  0x5a   : > { %284 = vmatprep.mubr.bf16.mxu0 %v678_v0  ;;  %252 = vmatprep.subr.bf16.mxu0 %v514_v1  ;;  %v517_v3 = vld [vmem:[%s156_s8 + $0x14] ss:$8 sps:$4 sm:$0xff]   ;;  %v519_v4 = vld [vmem:[%s156_s8 + $0x10] ss:$8 sps:$4 sm:$0xff]   ;;  %v520_v5 = vld [vmem:[%s156_s8 + $0x24] ss:$8 sps:$4 sm:$0xff]  }
  0x5b   : > { %253 = vmatpush1.bf16.msra.mxu0 %v516_v2  ;;  %v522_v6 = vld [vmem:[%s156_s8 + $0x20] ss:$8 sps:$4 sm:$0xff]   ;;  %v523_v7 = vld [vmem:[%s156_s8 + $0x34] ss:$8 sps:$4 sm:$0xff]   ;;  %v525_v9 = vld [vmem:[%s156_s8 + $0x30] ss:$8 sps:$4 sm:$0xff]  }
  0x5c   : > { %254 = vmatprep.subr.bf16.mxu0 %v517_v3  ;;  %v190_v8 = vld [vmem:[%s156_s8 + $0x40] sm:$0xff]  ;;  %vm245_vm0 = vcmask 1043456   ;;  %v528_v13 = vld [vmem:[#allocation2] sm:$0xff]   ;;  %vm241_vm1 = vcmask 588800   ;;  %s426_s20 = sshll.u32 %s837_s5, 4  ;;  %s448_s23 = sshll.u32 %s716_s13, 8 }
  0x5d   : > { %v437_v10 = vcombine.high %v190_v8, %v190_v8  ;;  %v436_v11 = vcombine.low %v190_v8, %v190_v8  ;;  %s176_s24 = scalar_lea.vmem [#allocation7], %s426_s20  ;;  %s850_s14 = scalar_lea.hbm %s896_s2, %s448_s23 }
  0x5e   : > { %s336_s4 = sshll.u32 %s176_s24, 4  ;;  %s322_s13 = scalar_lea.sflag [#allocation4], %s837_s5  ;;  %s852_s4 = int_to_ptr.vmem [resolvable:$true] %s336_s4 }
  0x5f   : > { %255 = vmatpush1.bf16.msra.mxu0 %v519_v4  ;;  %v247_v12 = vsel %vm245_vm0, %v436_v11, 0  ;;  %s599_s16 = scalar_lea.vmem %s852_s4, 256  ;;  %p914_p9 = scmp.ne.s32.totalorder %s903_s21, 0 }
  0x60   : > { %256 = vmatprep.subr.bf16.mxu0 %v520_v5  ;;  %p600_p0 = scmp.ne.s32.totalorder %s852_s4, %s599_s16  ;;  %s679_s27 = smov [#allocation7]  }
  0x61   : > { %s603_s17 = sshll.u32 %s679_s27, 4  ;;  %s604_s17 = int_to_ptr.vmem [resolvable:$false] %s603_s17 }
  0x62   : > { %p601_p10 = pnand %p600_p0, %p914_p9  ;;  %s605_s28 = scalar_lea.vmem %s604_s17, 512 }
  0x63   : > { %257 = vmatpush1.bf16.msra.mxu0 %v522_v6  ;;  %p606_p4 = scmp.lt.s32.totalorder %s852_s4, %s604_s17  ;;  %p607_p7 = scmp.lt.s32.totalorder %s605_s28, %s599_s16 }
  0x64   : > { %258 = vmatprep.subr.bf16.mxu0 %v523_v7  ;;  %p602_p1 = pneg %p601_p10 }
  0x65   : > { %p608_p5 = por %p607_p7, %p606_p4 }
  0x67   : > { %259 = vmatpush1.bf16.msra.mxu0 %v525_v9  ;;  %p609_p11 = pnand %p608_p5, %p602_p1 }
  0x68   : > { %438 = vmatprep.subr.msk.bf16.mxu0 %vm245_vm0, %v437_v10 }
  0x6b   : > { %261 = vmatpush1.bf16.msra.mxu0 %v247_v12 }
  0x6e   : > { %439 = vmatmul.mubr.msk.bf16.vlgmr.msra.gmra.mrb[0].mxu0 %vm241_vm1, %v528_v13 }
 0x141   : > { %v286_v14 = vpop.f32.mrb[0].mxu0 }
 0x142   : > { %v288_v15 = vpop.f32.mrb[1].mxu0  ;;  %v297_v20 = vmin.f32 %v286_v14, 0.0  ;;  %vm295_vm2 = vcmp.gt.f32.partialorder %v286_v14, 0.0 }
 0x143   : > { %v290_v16 = vpop.f32.mrb[2].mxu0  ;;  %v298_v22 = vmin.f32 %v288_v15, 0.0  ;;  %vm296_vm3 = vcmp.gt.f32.partialorder %v288_v15, 0.0 }
 0x144   : > { %v307_v17 = vsub.f32 0.0, %v290_v16  ;;  %v292_v18 = vpop.f32.mrb[3].mxu0  ;;  %v299_v24 = vmul.f32 1.442695, %v297_v20 }
 0x145   : > { %v308_v19 = vsub.f32 0.0, %v292_v18  ;;  %v301_v25 = vmul.f32 1.442695, %v298_v22 }
 0x146   : > { %v309_v21 = vmul.f32 1.442695, %v307_v17 }
 0x147   : > { %v311_v23 = vmul.f32 1.442695, %v308_v19 }
 0x148   : > { %529 = vpow2.f32 %v309_v21 }
 0x149   : > { %531 = vpow2.f32 %v311_v23 }
 0x14a   : > { %533 = vpow2.f32 %v299_v24 }
 0x14b   : > { %535 = vpow2.f32 %v301_v25 }
 0x152   : > { %v530_v26 = vpop.eup %529 }
 0x153   : > { %v532_v27 = vpop.eup %531  ;;  %v313_v28 = vadd.f32 1.0, %v530_v26 }
 0x154   : > { %v314_v29 = vadd.f32 1.0, %v532_v27  ;;  %v534_v30 = vpop.eup %533 }
 0x155   : > { %537 = vrcp.f32 %v313_v28  ;;  %v536_v31 = vpop.eup %535  ;;  %v440_v32 = vadd.f32 -1.0, %v534_v30 }
 0x156   : > { %539 = vrcp.f32 %v314_v29  ;;  %v441_v33 = vadd.f32 -1.0, %v536_v31 }
 0x157   : > { %v305_v35 = vsel %vm295_vm2, %v286_v14, %v440_v32 }
 0x158   : > { %v306_v37 = vsel %vm296_vm3, %v288_v15, %v441_v33 }
 0x15f   : > { %v538_v34 = vpop.eup %537 }
 0x160   : > { %v540_v36 = vpop.eup %539  ;;  %v317_v38 = vmul.f32 %v538_v34, %v305_v35 }
 0x161   : > { %v318_v39 = vmul.f32 %v540_v36, %v306_v37 }
 0x162   : > { %319 = vst [vmem:[%s176_s24] sm:$0xff] %v317_v38 }
 0x163   : > { %320 = vst [vmem:[%s176_s24 + $0x8] sm:$0xff] %v318_v39 }
 0x164   : > { %612 = shalt.err (!%p609_p11)
}
 0x165   : > { %s613_s29 = scalar_lea.hbm %s850_s14, 256  ;;  %s617_s25 = scalar_lea.hbm %s896_s2, 512 }
 0x166   : > { %p614_p13 = scmp.ne.s32.totalorder %s850_s14, %s613_s29  ;;  %p618_p12 = scmp.lt.u32.totalorder %s850_s14, %s896_s2 }
 0x167   : > { %p619_p3 = scmp.lt.u32.totalorder %s617_s25, %s613_s29  ;;  %p621_p0 = scmp.lt.u32.totalorder %s613_s29, %s850_s14 }
 0x168   : > { %p615_p2 = pnand %p614_p13, %p914_p9 }
 0x169   : > { %p620_p8 = por %p619_p3, %p618_p12 }
 0x16a   : > { %p616_p6 = pneg %p615_p2 }
 0x16b   : > { %p622_p10 = por %p621_p0, %p620_p8 }
 0x16d   : > { %p623_p1 = pnand %p622_p10, %p616_p6 }
 0x16f   : > { %626 = shalt.err (!%p623_p1)
}
 0x170   : > { %457 = dma.vmem_to_hbm [thread:$0]  (%p914_p9), %s852_s4, 256, %s850_s14, %s322_s13  }
 0x171 PF: > { %s348_s7 = sand.u32 1, %s657_s9   ;;  %p915_p4 = scmp.ne.s32.totalorder %s904_s22, 0 }
 0x172   : > { %p916_p7 = scmp.ge.s32.totalorder %s669_s12, 2  ;;  %s349_s8 = scalar_lea.sflag [#allocation4], %s348_s7 }
 0x174   : > { %p468_p5 = pnand %p916_p7, %p915_p4 }
 0x176   : > { %652 = dma.done.wait (!%p468_p5), %s349_s8, 256  }
 0x177   : > { %654 = vsyncadd (!%p468_p5), %s349_s8, 4294967040  ;;  %p16_p11 = scmp.ge.s32.totalorder %s720_s15, 4   ;;  %s917_s9 = smov %s661_s10 }
 0x178   : > { %s918_s10 = smov %s665_s11  ;;  %s919_s11 = smov %s732_s18 }
 0x179   : > { %s920_s12 = smov %s720_s15  ;;  %18 = sbr.rel (!%p16_p11) target bundleno = 6 (0x6), region = 78 }
 0x180   :  { %354 = vsyncpa [#allocation3], 1 }
 0x181   :  { %356 = vsyncpa [#allocation3 + $0x1], 1 }
 0x182   :  { %357 = vsyncpa [#allocation6], 1 }
 0x183   :  { %359 = vsyncpa [#allocation6 + $0x1], 1 }
 0x184   :  { %360 = vsyncpa [#allocation4], 1 }
 0x185   :  { %362 = vsyncpa [#allocation4 + $0x1], 1 }

</bundles_post_ra>
